<compile_context>
chip_gen: v5e
topology: v5e:2x2
jax: 0.10.0
libtpu: 0.0.40
codegen_flags: <defaults>
</compile_context>

<pallas_src>
import jax
import jax.numpy as jnp
from jax.experimental import pallas as pl
from jax.experimental.pallas import tpu as pltpu


# ----------------------------- Pallas kernel ------------------------------- #

def residual_block_kernel(x_ref, w1_ref, b1_ref, w2_ref, b2_ref, out_ref, pad_ref):
    """Fused residual block for one batch element.

    x_ref   : (1, H, W*C)      compute dtype (bf16/f32), channels-last flattened
    w*_ref  : (3, W*C, W*C)    banded conv weights, one (W*C, W*C) matrix per kh
    b*_ref  : (1, W*C)         f32 bias, already tiled across W
    out_ref : (1, H, W*C)      f32 output
    pad_ref : (H+2, W*C)       VMEM scratch, vertically padded activation
    """
    H = out_ref.shape[1]
    WC = out_ref.shape[2]

    x2d = x_ref[0]                                            # (H, W*C)

    # Zero halo rows (vertical SAME padding). Horizontal padding is folded into
    # the banded weight matrices, so no lane-offset writes are needed.
    zero_row = jnp.zeros((1, WC), pad_ref.dtype)
    pad_ref[0:1, :] = zero_row
    pad_ref[H + 1:H + 2, :] = zero_row

    def conv3x3(w_ref, bias_row):
        # 3 lane-dense matmuls (one per kernel row), f32 accumulation.
        acc = jnp.zeros((H, WC), jnp.float32)
        for kh in range(3):
            acc = acc + jnp.dot(pad_ref[kh:kh + H, :], w_ref[kh],
                                preferred_element_type=jnp.float32)
        return acc + bias_row                                  # (H, W*C) f32

    # conv1 + ReLU (intermediate stays in VMEM, no HBM round trip)
    pad_ref[1:H + 1, :] = x2d
    h = jnp.maximum(conv3x3(w1_ref, b1_ref[...]), 0.0)

    # conv2 + residual + ReLU
    pad_ref[1:H + 1, :] = h.astype(pad_ref.dtype)
    out = conv3x3(w2_ref, b2_ref[...]) + x2d.astype(jnp.float32)
    out_ref[0] = jnp.maximum(out, 0.0).astype(out_ref.dtype)


# ------------------------------ JAX wrappers ------------------------------- #

def _banded_weights(w_oihw, W, dtype):
    """OIHW (Cout, Cin, 3, 3) -> (3, W*C, W*C) block-banded matrices.

    B[kh][(w+kw-1)*C + ci, w*C + co] = weight[co, ci, kh, kw]; out-of-range
    columns (horizontal SAME padding) are simply dropped by the offset eye.
    """
    C = w_oihw.shape[0]
    w_hwio = jnp.transpose(w_oihw, (2, 3, 1, 0)).astype(jnp.float32)  # (3,3,Ci,Co)
    mats = []
    for kh in range(3):
        m = jnp.zeros((W * C, W * C), jnp.float32)
        for kw in range(3):
            m = m + jnp.kron(jnp.eye(W, k=1 - kw, dtype=jnp.float32),
                             w_hwio[kh, kw])
        mats.append(m)
    return jnp.stack(mats).astype(dtype)                       # (3, W*C, W*C)


def residual_block(x_nchw, w1_oihw, b1, w2_oihw, b2, *,
                   compute_dtype=jnp.bfloat16):
    """Forward pass of ResidualBlock; input/output are NCHW (PyTorch layout)."""
    B, C, H, W = x_nchw.shape
    WC = W * C

    # Layout glue (done once per block here; in a real model keep NHWC end-to-end).
    x2d = jnp.transpose(x_nchw, (0, 2, 3, 1)).reshape(B, H, WC).astype(compute_dtype)
    w1b = _banded_weights(w1_oihw, W, compute_dtype)
    w2b = _banded_weights(w2_oihw, W, compute_dtype)
    b1r = jnp.tile(b1.astype(jnp.float32), W).reshape(1, WC)
    b2r = jnp.tile(b2.astype(jnp.float32), W).reshape(1, WC)

    out2d = pl.pallas_call(
        residual_block_kernel,
        out_shape=jax.ShapeDtypeStruct((B, H, WC), jnp.float32),
        grid_spec=pltpu.PrefetchScalarGridSpec(
            num_scalar_prefetch=0,
            grid=(B,),
            in_specs=[
                pl.BlockSpec((1, H, WC), lambda b: (b, 0, 0)),      # x (lane-dense)
                pl.BlockSpec((3, WC, WC), lambda b: (0, 0, 0)),     # banded W1
                pl.BlockSpec((1, WC), lambda b: (0, 0)),            # bias1
                pl.BlockSpec((3, WC, WC), lambda b: (0, 0, 0)),     # banded W2
                pl.BlockSpec((1, WC), lambda b: (0, 0)),            # bias2
            ],
            out_specs=pl.BlockSpec((1, H, WC), lambda b: (b, 0, 0)),
            scratch_shapes=[pltpu.VMEM((H + 2, WC), compute_dtype)],
        ),
        compiler_params=pltpu.CompilerParams(
            dimension_semantics=("parallel",),
        ),
    )(x2d, w1b, b1r, w2b, b2r)

    out = out2d.reshape(B, H, W, C)
    return jnp.transpose(out, (0, 3, 1, 2))                    # NHWC -> NCHW


# ---------------------------- pure-JAX reference ---------------------------- #

def _ref_residual_block(x_nchw, w1, b1, w2, b2):
    def conv(x, w, b):
        y = jax.lax.conv_general_dilated(
            x, w, window_strides=(1, 1), padding="SAME",
            dimension_numbers=("NCHW", "OIHW", "NCHW"))
        return y + b.reshape(1, -1, 1, 1)
    h = jnp.maximum(conv(x_nchw, w1, b1), 0.0)
    return jnp.maximum(conv(h, w2, b2) + x_nchw, 0.0)


# ----------------------------------- main ----------------------------------- #

if __name__ == "__main__":
    B, C, H, W = 2, 8, 16, 16        # W*C = 128 -> fully lane-dense tiles
    key = jax.random.PRNGKey(0)
    kx, k1, k2, k3, k4 = jax.random.split(key, 5)

    x = jax.random.normal(kx, (B, C, H, W), dtype=jnp.float32)
    # Deterministic parameter init (shapes match nn.Conv2d(C, C, 3, padding=1)).
    w1 = 0.1 * jax.random.normal(k1, (C, C, 3, 3), dtype=jnp.float32)
    b1 = 0.1 * jax.random.normal(k2, (C,), dtype=jnp.float32)
    w2 = 0.1 * jax.random.normal(k3, (C, C, 3, 3), dtype=jnp.float32)
    b2 = 0.1 * jax.random.normal(k4, (C,), dtype=jnp.float32)

    ref = _ref_residual_block(x, w1, b1, w2, b2)

    # Strict structural check in f32.
    out_f32 = residual_block(x, w1, b1, w2, b2, compute_dtype=jnp.float32)
    out_f32 = jax.block_until_ready(out_f32)
    assert out_f32.shape == (B, C, H, W)
    assert jnp.allclose(out_f32, ref, atol=1e-3, rtol=1e-3), "f32 mismatch vs reference"

    # Production path: bf16 activations/weights, f32 accumulation.
    out_bf16 = residual_block(x, w1, b1, w2, b2, compute_dtype=jnp.bfloat16)
    out_bf16 = jax.block_until_ready(out_bf16)
    assert out_bf16.shape == (B, C, H, W)
    assert jnp.allclose(out_bf16, ref, atol=1e-1, rtol=1e-1), "bf16 mismatch vs reference"

    print("KERNEL_OK")
</pallas_src>

<mosaic_0001>
module attributes {stable_mosaic.version = 11 : i64} {
  func.func @residual_block_kernel(%arg0: i32, %arg1: memref<1x16x128xf32, #tpu.memory_space<vmem>>, %arg2: memref<3x128x128xf32, #tpu.memory_space<vmem>>, %arg3: memref<1x128xf32, #tpu.memory_space<vmem>>, %arg4: memref<3x128x128xf32, #tpu.memory_space<vmem>>, %arg5: memref<1x128xf32, #tpu.memory_space<vmem>>, %arg6: memref<1x16x128xf32, #tpu.memory_space<vmem>>, %arg7: memref<18x128xf32, #tpu.memory_space<vmem>>) attributes {dimension_semantics = [#tpu.dimension_semantics<parallel>], iteration_bounds = array<i64: 2>, scalar_prefetch = 0 : i64, scratch_operands = 1 : i64, tpu.core_type = #tpu.core_type<tc>, window_params = [{transform_indices = @transform_0, window_bounds = array<i64: 1, 16, 128>}, {pipeline_mode = #tpu.pipeline_mode<synchronous>, transform_indices = @transform_1, window_bounds = array<i64: 3, 128, 128>}, {pipeline_mode = #tpu.pipeline_mode<synchronous>, transform_indices = @transform_2, window_bounds = array<i64: 1, 128>}, {pipeline_mode = #tpu.pipeline_mode<synchronous>, transform_indices = @transform_3, window_bounds = array<i64: 3, 128, 128>}, {pipeline_mode = #tpu.pipeline_mode<synchronous>, transform_indices = @transform_4, window_bounds = array<i64: 1, 128>}, {transform_indices = @transform_5, window_bounds = array<i64: 1, 16, 128>}]} {
    %c0 = arith.constant 0 : index
    %c0_0 = arith.constant 0 : index
    %c0_1 = arith.constant 0 : index
    %0 = vector.load %arg1[%c0, %c0_0, %c0_1] : memref<1x16x128xf32, #tpu.memory_space<vmem>>, vector<1x16x128xf32>
    %1 = vector.shape_cast %0 : vector<1x16x128xf32> to vector<16x128xf32>
    %cst = arith.constant 0.000000e+00 : f32
    %2 = vector.broadcast %cst : f32 to vector<1x128xf32>
    %c0_2 = arith.constant 0 : index
    %c0_3 = arith.constant 0 : index
    %3 = vector.load %arg7[%c0_2, %c0_3] : memref<18x128xf32, #tpu.memory_space<vmem>>, vector<1x128xf32>
    tpu.vector_store %arg7[%c0_2, %c0_3], %2 {strides = array<i32>} : memref<18x128xf32, #tpu.memory_space<vmem>>, vector<1x128xf32>,
    %c17 = arith.constant 17 : index
    %c0_4 = arith.constant 0 : index
    %4 = vector.load %arg7[%c17, %c0_4] : memref<18x128xf32, #tpu.memory_space<vmem>>, vector<1x128xf32>
    tpu.vector_store %arg7[%c17, %c0_4], %2 {strides = array<i32>} : memref<18x128xf32, #tpu.memory_space<vmem>>, vector<1x128xf32>,
    %c1 = arith.constant 1 : index
    %c0_5 = arith.constant 0 : index
    %5 = vector.load %arg7[%c1, %c0_5] : memref<18x128xf32, #tpu.memory_space<vmem>>, vector<16x128xf32>
    tpu.vector_store %arg7[%c1, %c0_5], %1 {strides = array<i32>} : memref<18x128xf32, #tpu.memory_space<vmem>>, vector<16x128xf32>,
    %c0_6 = arith.constant 0 : index
    %c0_7 = arith.constant 0 : index
    %6 = vector.load %arg3[%c0_6, %c0_7] : memref<1x128xf32, #tpu.memory_space<vmem>>, vector<1x128xf32>
    %cst_8 = arith.constant 0.000000e+00 : f32
    %7 = vector.broadcast %cst_8 : f32 to vector<16x128xf32>
    %c0_9 = arith.constant 0 : index
    %c0_10 = arith.constant 0 : index
    %8 = vector.load %arg7[%c0_9, %c0_10] : memref<18x128xf32, #tpu.memory_space<vmem>>, vector<16x128xf32>
    %c0_11 = arith.constant 0 : index
    %c0_12 = arith.constant 0 : index
    %c0_13 = arith.constant 0 : index
    %9 = vector.load %arg2[%c0_11, %c0_12, %c0_13] : memref<3x128x128xf32, #tpu.memory_space<vmem>>, vector<1x128x128xf32>
    %10 = vector.shape_cast %9 : vector<1x128x128xf32> to vector<128x128xf32>
    %cst_14 = arith.constant dense<0.000000e+00> : vector<16x128xf32>
    %11 = tpu.matmul %8, %10, %cst_14 {dimension_numbers = #tpu.dot_dimension_numbers<[1], [0], [0], [1], [0, 0, 1, 1], [], []>} : vector<16x128xf32>, vector<128x128xf32>, vector<16x128xf32> -> vector<16x128xf32>
    %12 = arith.addf %7, %11 : vector<16x128xf32>
    %c1_15 = arith.constant 1 : index
    %c0_16 = arith.constant 0 : index
    %13 = vector.load %arg7[%c1_15, %c0_16] : memref<18x128xf32, #tpu.memory_space<vmem>>, vector<16x128xf32>
    %c1_17 = arith.constant 1 : index
    %c0_18 = arith.constant 0 : index
    %c0_19 = arith.constant 0 : index
    %14 = vector.load %arg2[%c1_17, %c0_18, %c0_19] : memref<3x128x128xf32, #tpu.memory_space<vmem>>, vector<1x128x128xf32>
    %15 = vector.shape_cast %14 : vector<1x128x128xf32> to vector<128x128xf32>
    %cst_20 = arith.constant dense<0.000000e+00> : vector<16x128xf32>
    %16 = tpu.matmul %13, %15, %cst_20 {dimension_numbers = #tpu.dot_dimension_numbers<[1], [0], [0], [1], [0, 0, 1, 1], [], []>} : vector<16x128xf32>, vector<128x128xf32>, vector<16x128xf32> -> vector<16x128xf32>
    %17 = arith.addf %12, %16 : vector<16x128xf32>
    %c2 = arith.constant 2 : index
    %c0_21 = arith.constant 0 : index
    %18 = vector.load %arg7[%c2, %c0_21] : memref<18x128xf32, #tpu.memory_space<vmem>>, vector<16x128xf32>
    %c2_22 = arith.constant 2 : index
    %c0_23 = arith.constant 0 : index
    %c0_24 = arith.constant 0 : index
    %19 = vector.load %arg2[%c2_22, %c0_23, %c0_24] : memref<3x128x128xf32, #tpu.memory_space<vmem>>, vector<1x128x128xf32>
    %20 = vector.shape_cast %19 : vector<1x128x128xf32> to vector<128x128xf32>
    %cst_25 = arith.constant dense<0.000000e+00> : vector<16x128xf32>
    %21 = tpu.matmul %18, %20, %cst_25 {dimension_numbers = #tpu.dot_dimension_numbers<[1], [0], [0], [1], [0, 0, 1, 1], [], []>} : vector<16x128xf32>, vector<128x128xf32>, vector<16x128xf32> -> vector<16x128xf32>
    %22 = arith.addf %17, %21 : vector<16x128xf32>
    %23 = vector.broadcast %6 : vector<1x128xf32> to vector<16x128xf32>
    %24 = arith.addf %22, %23 : vector<16x128xf32>
    %cst_26 = arith.constant 0.000000e+00 : f32
    %25 = vector.broadcast %cst_26 : f32 to vector<16x128xf32>
    %26 = arith.maximumf %24, %25 : vector<16x128xf32>
    %c1_27 = arith.constant 1 : index
    %c0_28 = arith.constant 0 : index
    %27 = vector.load %arg7[%c1_27, %c0_28] : memref<18x128xf32, #tpu.memory_space<vmem>>, vector<16x128xf32>
    tpu.vector_store %arg7[%c1_27, %c0_28], %26 {strides = array<i32>} : memref<18x128xf32, #tpu.memory_space<vmem>>, vector<16x128xf32>,
    %c0_29 = arith.constant 0 : index
    %c0_30 = arith.constant 0 : index
    %28 = vector.load %arg5[%c0_29, %c0_30] : memref<1x128xf32, #tpu.memory_space<vmem>>, vector<1x128xf32>
    %cst_31 = arith.constant 0.000000e+00 : f32
    %29 = vector.broadcast %cst_31 : f32 to vector<16x128xf32>
    %c0_32 = arith.constant 0 : index
    %c0_33 = arith.constant 0 : index
    %30 = vector.load %arg7[%c0_32, %c0_33] : memref<18x128xf32, #tpu.memory_space<vmem>>, vector<16x128xf32>
    %c0_34 = arith.constant 0 : index
    %c0_35 = arith.constant 0 : index
    %c0_36 = arith.constant 0 : index
    %31 = vector.load %arg4[%c0_34, %c0_35, %c0_36] : memref<3x128x128xf32, #tpu.memory_space<vmem>>, vector<1x128x128xf32>
    %32 = vector.shape_cast %31 : vector<1x128x128xf32> to vector<128x128xf32>
    %cst_37 = arith.constant dense<0.000000e+00> : vector<16x128xf32>
    %33 = tpu.matmul %30, %32, %cst_37 {dimension_numbers = #tpu.dot_dimension_numbers<[1], [0], [0], [1], [0, 0, 1, 1], [], []>} : vector<16x128xf32>, vector<128x128xf32>, vector<16x128xf32> -> vector<16x128xf32>
    %34 = arith.addf %29, %33 : vector<16x128xf32>
    %c1_38 = arith.constant 1 : index
    %c0_39 = arith.constant 0 : index
    %35 = vector.load %arg7[%c1_38, %c0_39] : memref<18x128xf32, #tpu.memory_space<vmem>>, vector<16x128xf32>
    %c1_40 = arith.constant 1 : index
    %c0_41 = arith.constant 0 : index
    %c0_42 = arith.constant 0 : index
    %36 = vector.load %arg4[%c1_40, %c0_41, %c0_42] : memref<3x128x128xf32, #tpu.memory_space<vmem>>, vector<1x128x128xf32>
    %37 = vector.shape_cast %36 : vector<1x128x128xf32> to vector<128x128xf32>
    %cst_43 = arith.constant dense<0.000000e+00> : vector<16x128xf32>
    %38 = tpu.matmul %35, %37, %cst_43 {dimension_numbers = #tpu.dot_dimension_numbers<[1], [0], [0], [1], [0, 0, 1, 1], [], []>} : vector<16x128xf32>, vector<128x128xf32>, vector<16x128xf32> -> vector<16x128xf32>
    %39 = arith.addf %34, %38 : vector<16x128xf32>
    %c2_44 = arith.constant 2 : index
    %c0_45 = arith.constant 0 : index
    %40 = vector.load %arg7[%c2_44, %c0_45] : memref<18x128xf32, #tpu.memory_space<vmem>>, vector<16x128xf32>
    %c2_46 = arith.constant 2 : index
    %c0_47 = arith.constant 0 : index
    %c0_48 = arith.constant 0 : index
    %41 = vector.load %arg4[%c2_46, %c0_47, %c0_48] : memref<3x128x128xf32, #tpu.memory_space<vmem>>, vector<1x128x128xf32>
    %42 = vector.shape_cast %41 : vector<1x128x128xf32> to vector<128x128xf32>
    %cst_49 = arith.constant dense<0.000000e+00> : vector<16x128xf32>
    %43 = tpu.matmul %40, %42, %cst_49 {dimension_numbers = #tpu.dot_dimension_numbers<[1], [0], [0], [1], [0, 0, 1, 1], [], []>} : vector<16x128xf32>, vector<128x128xf32>, vector<16x128xf32> -> vector<16x128xf32>
    %44 = arith.addf %39, %43 : vector<16x128xf32>
    %45 = vector.broadcast %28 : vector<1x128xf32> to vector<16x128xf32>
    %46 = arith.addf %44, %45 : vector<16x128xf32>
    %47 = arith.addf %46, %1 : vector<16x128xf32>
    %cst_50 = arith.constant 0.000000e+00 : f32
    %48 = vector.broadcast %cst_50 : f32 to vector<16x128xf32>
    %49 = arith.maximumf %47, %48 : vector<16x128xf32>
    %c0_51 = arith.constant 0 : index
    %c0_52 = arith.constant 0 : index
    %c0_53 = arith.constant 0 : index
    %50 = vector.load %arg6[%c0_51, %c0_52, %c0_53] : memref<1x16x128xf32, #tpu.memory_space<vmem>>, vector<1x16x128xf32>
    %51 = vector.shape_cast %50 : vector<1x16x128xf32> to vector<16x128xf32>
    %52 = vector.shape_cast %49 : vector<16x128xf32> to vector<1x16x128xf32>
    tpu.vector_store %arg6[%c0_51, %c0_52, %c0_53], %52 {strides = array<i32>} : memref<1x16x128xf32, #tpu.memory_space<vmem>>, vector<1x16x128xf32>,
    return
  }
  func.func @transform_0(%arg0: i32) -> (i32, i32, i32) {
    %c0_i32 = arith.constant 0 : i32
    %c0_i32_0 = arith.constant 0 : i32
    %c0_i32_1 = arith.constant 0 : i32
    return %arg0, %c0_i32, %c0_i32_0 : i32, i32, i32
  }
  func.func @transform_1(%arg0: i32) -> (i32, i32, i32) {
    %c0_i32 = arith.constant 0 : i32
    %c0_i32_0 = arith.constant 0 : i32
    %c0_i32_1 = arith.constant 0 : i32
    %c0_i32_2 = arith.constant 0 : i32
    return %c0_i32, %c0_i32_0, %c0_i32_1 : i32, i32, i32
  }
  func.func @transform_2(%arg0: i32) -> (i32, i32) {
    %c0_i32 = arith.constant 0 : i32
    %c0_i32_0 = arith.constant 0 : i32
    %c0_i32_1 = arith.constant 0 : i32
    return %c0_i32, %c0_i32_0 : i32, i32
  }
  func.func @transform_3(%arg0: i32) -> (i32, i32, i32) {
    %c0_i32 = arith.constant 0 : i32
    %c0_i32_0 = arith.constant 0 : i32
    %c0_i32_1 = arith.constant 0 : i32
    %c0_i32_2 = arith.constant 0 : i32
    return %c0_i32, %c0_i32_0, %c0_i32_1 : i32, i32, i32
  }
  func.func @transform_4(%arg0: i32) -> (i32, i32) {
    %c0_i32 = arith.constant 0 : i32
    %c0_i32_0 = arith.constant 0 : i32
    %c0_i32_1 = arith.constant 0 : i32
    return %c0_i32, %c0_i32_0 : i32, i32
  }
  func.func @transform_5(%arg0: i32) -> (i32, i32, i32) {
    %c0_i32 = arith.constant 0 : i32
    %c0_i32_0 = arith.constant 0 : i32
    %c0_i32_1 = arith.constant 0 : i32
    return %arg0, %c0_i32, %c0_i32_0 : i32, i32, i32
  }
}

</mosaic_0001>

<bundles_post_ra>
// kernel: tpu_custom_call.1
= control target key start
LH: loop header
LB: loop body
LE: loop exit
PB: predicated region body
PF: predicated region fallthrough
CT: control target
= control target key end

     0   :  { %10 = vsyncpa [#allocation4], 0  ;;  %s1167_s0 = inlined_call_operand.hbm [shape: f32[2,16,128], index: 0, kind: input, shape index: {}]   ;;  %s1168_s1 = inlined_call_operand.hbm [shape: f32[3,128,128], index: 1, kind: input, shape index: {}]   ;;  %s1169_s2 = inlined_call_operand.vmem [shape: f32[1,128], index: 2, kind: input, shape index: {}]   ;;  %s1170_s3 = inlined_call_operand.hbm [shape: f32[3,128,128], index: 3, kind: input, shape index: {}]   ;;  %s1171_s4 = inlined_call_operand.vmem [shape: f32[1,128], index: 4, kind: input, shape index: {}]   ;;  %s1172_s5 = inlined_call_operand.hbm [shape: f32[2,16,128], index: 5, kind: output, shape index: {}]  }
   0x1   :  { %12 = vsyncpa [#allocation4 + $0x1], 0 }
   0x2   :  { %13 = vsyncpa [#allocation7], 0 }
   0x3   :  { %14 = vsyncpa [#allocation5], 0 }
   0x4   :  { %16 = vsyncpa [#allocation5 + $0x1], 0  ;;  %s993_s18 = smov 0   ;;  %s995_s19 = smov 0  }
   0x5   :  { %s997_s20 = smov 0   ;;  %s999_s21 = smov 0  }
   0x6 LB: > { %s1014_s22 = sadd.s32 4294967295, %s954_s21   ;;  %s668_s23 = sadd.s32 4294967294, %s954_s21   ;;  %s954_s21 = sphi %s999_s21, %s1184_s21   ;;  %s950_s20 = sphi %s997_s20, %s1183_s20   ;;  %s946_s19 = sphi %s995_s19, %s1182_s19   ;;  %s942_s18 = sphi %s993_s18, %s1181_s18  }
   0x7   : > { %p42_p0 = scmp.ne.s32.totalorder %s946_s19, %s942_s18  ;;  %p43_p1 = scmp.eq.s32.totalorder %s1014_s22, 0 }
   0x8   : > { %p150_p2 = scmp.eq.s32.totalorder %s1014_s22, 1  ;;  %p156_p3 = scmp.eq.s32.totalorder %s668_s23, 1 }
   0x9   : > { %p1023_p4 = por %p43_p1, %p42_p0  ;;  %p669_p5 = scmp.ge.s32.totalorder %s954_s21, 1 }
   0xa   : > { %p1028_p6 = por %p156_p3, %p42_p0  ;;  %p163_p7 = scmp.lt.s32.totalorder %s954_s21, 3 }
   0xb   : > { %s174_s28 = sshll.u32 %s1168_s1, 4  ;;  %s956_s30 = smov [#allocation6]   ;;  %s175_s28 = int_to_ptr.hbm [resolvable:$true] %s174_s28 }
   0xc   : > { %p1036_p8 = pnand %p669_p5, %p163_p7  ;;  %s176_s6 = sshll.u32 %s956_s30, 4  ;;  %s177_s6 = int_to_ptr.vmem [resolvable:$true] %s176_s6 }
   0xd   : > { %s191_s9 = sshll.u32 %s1170_s3, 4  ;;  %s1173_s10 = smov 128   ;;  %s192_s9 = int_to_ptr.hbm [resolvable:$true] %s191_s9 }
   0xe   : > { %p732_p9 = pneg %p1036_p8  ;;  %s958_s11 = smov 8  }
   0xf   : > { %s959_s12 = smov [#allocation8]   ;;  %s1055_s14 = sadd.s32 1, %s954_s21  }
  0x10   : > { %p733_p10 = pnand %p732_p9, %p43_p1  ;;  %s193_s13 = sshll.u32 %s959_s12, 4  ;;  %s194_s13 = int_to_ptr.vmem [resolvable:$true] %s193_s13 }
  0x11   : > { %s29_s15 = sadd.s32 1, %s950_s20  ;;  %s26_s16 = ssub.s32 %s954_s21, %s1055_s14 }
  0x12   : > { %735 = dma.hbm_to_vmem [thread:$0]  (!%p733_p10), %s175_s28, 6144, %s177_s6, [#allocation7], %s1173_s10, %s1173_s10, %s958_s11  }
  0x13   : > { %738 = dma.hbm_to_vmem [thread:$0]  (!%p733_p10), %s192_s9, 6144, %s194_s13, [#allocation7], %s1173_s10, %s1173_s10, %s958_s11  }
  0x14   : > { %p36_p12 = scmp.ne.s32.totalorder %s950_s20, %s946_s19  ;;  %p27_p13 = scmp.eq.s32.totalorder %s26_s16, 0 }
  0x15   : > { %p37_p0 = scmp.eq.s32.totalorder %s954_s21, 0  ;;  %p749_p5 = scmp.lt.s32.totalorder %s954_s21, 2 }
  0x16   : > { %p1065_p3 = por %p150_p2, %p36_p12  ;;  %s210_s26 = sand.u32 1, %s950_s20  }
  0x17   : > { %s1071_s23 = scalar_select %p27_p13, %s950_s20, %s29_s15  }
  0x18   : > { %p38_p7 = por %p37_p0, %p36_p12  ;;  %s673_s27 = sshll.u32 %s210_s26, 4 }
  0x19   : > { %s686_s28 = sshll.u32 %s954_s21, 4  ;;  %s214_s8 = scalar_lea.vmem [#allocation3], %s673_s27 }
  0x1a   : > { %s219_s7 = scalar_lea.hbm %s1167_s0, %s686_s28  ;;  %s222_s9 = sshll.u32 %s214_s8, 4  ;;  %s223_s9 = int_to_ptr.vmem [resolvable:$true] %s222_s9 }
  0x1b   : > { %s220_s12 = sshll.u32 %s219_s7, 4  ;;  %p1078_p2 = pnand %p749_p5, %p38_p7  ;;  %s221_s12 = int_to_ptr.hbm [resolvable:$true] %s220_s12 }
  0x1c   : > { %s211_s15 = scalar_lea.sflag [#allocation4], %s210_s26  ;;  %s854_s16 = sshra.s32 %s221_s12, 4  ;;  %s855_s16 = int_to_ptr.hbm [resolvable:$true] %s854_s16 }
  0x1d   : > { %s856_s10 = scalar_lea.hbm %s855_s16, 16  ;;  %p858_p10 = pneg %p1078_p2 }
  0x1e   : > { %p857_p9 = scmp.ne.s32.totalorder %s855_s16, %s856_s10  ;;  %s861_s30 = scalar_lea.hbm %s1167_s0, 32 }
  0x1f   : > { %p862_p0 = scmp.lt.s32.totalorder %s855_s16, %s1167_s0  ;;  %p863_p5 = scmp.lt.s32.totalorder %s861_s30, %s856_s10 }
  0x20   : > { %p859_p12 = pnand %p858_p10, %p857_p9 }
  0x21   : > { %p864_p7 = por %p863_p5, %p862_p0 }
  0x22   : > { %p860_p13 = pneg %p859_p12 }
  0x24   : > { %p865_p11 = pnand %p864_p7, %p860_p13 }
  0x26   : > { %868 = shalt.err (!%p865_p11)
}
  0x27   : > { %s1179_s26 = smov 128   ;;  %234 = sbr.rel (%p1036_p8) target bundleno = 379 (0x17b), region = 40 }
  0x28   : > { %742 = dma.hbm_to_vmem [thread:$0]  (!%p1078_p2), %s221_s12, 256, %s223_s9, %s211_s15, %s1179_s26, %s1179_s26, %s958_s11  }
  0x29   : > { %s1098_s8 = sand.u32 (!%p1036_p8), 1, %s946_s19  }
  0x2a   : > { %s677_s10 = sshll.u32 (!%p1036_p8), %s1098_s8, 4  ;;  %s237_s16 = scalar_lea.sflag (!%p1036_p8), [#allocation4], %s1098_s8 }
  0x2b   : > { %s1104_s28 = scalar_lea.vmem (!%p1036_p8), [#allocation3], %s677_s10 }
  0x2c   : > { %929 = dma.done.wait (%p1023_p4), %s237_s16, 256  }
  0x2d   : > { %931 = vsyncadd (%p1023_p4), %s237_s16, 4294967040 }
  0x2e   : > { %933 = dma.done.wait (%p43_p1), [#allocation7], 12288  }
  0x2f   : > { %935 = vsyncadd (%p43_p1), [#allocation7], 4294955008  ;;  %v960_v0 = vmov 0.0   ;;  %v386_v1 = vld [vmem:[#allocation6 + $0x178] sm:$0xff]  ;;  %v385_v2 = vld [vmem:[#allocation6 + $0x170] sm:$0xff]  ;;  %s687_s12 = sshll.u32 %s1014_s22, 4 }
  0x30   : > { %280 = vst [vmem:[#allocation2] sm:$0x1] %v960_v0  ;;  %v321_v3 = vld [vmem:[#allocation6 + $0xf8] sm:$0xff]  ;;  %387 = vmatpush.msra.mxu2 %v386_v1  ;;  %v320_v5 = vld [vmem:[#allocation6 + $0xf0] sm:$0xff]  ;;  %v384_v6 = vld [vmem:[#allocation6 + $0x168] sm:$0xff]  ;;  %s572_s27 = scalar_lea.hbm %s1172_s5, %s687_s12  ;;  %s277_s30 = scalar_lea.vmem [#allocation9], %s677_s10 }
  0x31   : > { %281 = vst [vmem:[#allocation2 + $0x11] sm:$0x1] %v960_v0  ;;  %322 = vmatpush.msra.mxu0 %v321_v3  ;;  %v302_v4 = vld [vmem:[#allocation6 + $0x78] sm:$0xff]  ;;  %v301_v7 = vld [vmem:[#allocation6 + $0x70] sm:$0xff]  ;;  %v319_v8 = vld [vmem:[#allocation6 + $0xe8] sm:$0xff]  ;;  %s573_s6 = sshll.u32 %s277_s30, 4  ;;  %s574_s6 = int_to_ptr.vmem [resolvable:$true] %s573_s6 }
  0x32   : > { %345 = vmatpush.msra.mxu1 %v302_v4  ;;  %388 = vmatpush.msra.mxu2 %v385_v2  ;;  %v300_v9 = vld [vmem:[#allocation6 + $0x68] sm:$0xff]  ;;  %v383_v10 = vld [vmem:[#allocation6 + $0x160] sm:$0xff]  ;;  %v382_v13 = vld [vmem:[#allocation6 + $0x158] sm:$0xff]  ;;  %s575_s7 = sshll.u32 %s572_s27, 4  ;;  %s561_s22 = scalar_lea.sflag [#allocation5], %s1098_s8  ;;  %s576_s7 = int_to_ptr.hbm [resolvable:$true] %s575_s7 }
  0x33   : > { %323 = vmatpush.msra.mxu0 %v320_v5  ;;  %v318_v11 = vld [vmem:[#allocation6 + $0xe0] sm:$0xff]  ;;  %v317_v14 = vld [vmem:[#allocation6 + $0xd8] sm:$0xff]  ;;  %v381_v16 = vld [vmem:[#allocation6 + $0x150] sm:$0xff]  ;;  %s898_s26 = sshra.s32 %s576_s7, 4  ;;  %s904_s24 = scalar_lea.hbm %s1172_s5, 32  ;;  %s899_s26 = int_to_ptr.hbm [resolvable:$true] %s898_s26 }
  0x34   : > { %346 = vmatpush.msra.mxu1 %v301_v7  ;;  %389 = vmatpush.msra.mxu2 %v384_v6  ;;  %v299_v12 = vld [vmem:[#allocation6 + $0x60] sm:$0xff]  ;;  %v298_v15 = vld [vmem:[#allocation6 + $0x58] sm:$0xff]  ;;  %v316_v17 = vld [vmem:[#allocation6 + $0xd0] sm:$0xff]  ;;  %s900_s16 = scalar_lea.hbm %s899_s26, 16  ;;  %p905_p11 = scmp.lt.s32.totalorder %s899_s26, %s1172_s5 }
  0x35   : > { %324 = vmatpush.msra.mxu0 %v319_v8  ;;  %v297_v18 = vld [vmem:[#allocation6 + $0x50] sm:$0xff]  ;;  %v380_v19 = vld [vmem:[#allocation6 + $0x148] sm:$0xff]  ;;  %v379_v22 = vld [vmem:[#allocation6 + $0x140] sm:$0xff]  ;;  %p901_p1 = scmp.ne.s32.totalorder %s899_s26, %s900_s16  ;;  %p906_p2 = scmp.lt.s32.totalorder %s904_s24, %s900_s16 }
  0x36   : > { %347 = vmatpush.msra.mxu1 %v300_v9  ;;  %390 = vmatpush.msra.mxu2 %v383_v10  ;;  %v315_v20 = vld [vmem:[#allocation6 + $0xc8] sm:$0xff]  ;;  %v314_v23 = vld [vmem:[#allocation6 + $0xc0] sm:$0xff]  ;;  %v378_v25 = vld [vmem:[#allocation6 + $0x138] sm:$0xff] }
  0x37   : > { %325 = vmatpush.msra.mxu0 %v318_v11  ;;  %v296_v21 = vld [vmem:[#allocation6 + $0x48] sm:$0xff]  ;;  %v295_v24 = vld [vmem:[#allocation6 + $0x40] sm:$0xff]  ;;  %v313_v26 = vld [vmem:[#allocation6 + $0xb8] sm:$0xff]  ;;  %p902_p4 = pnand %p901_p1, %p1065_p3  ;;  %p907_p9 = por %p906_p2, %p905_p11 }
  0x38   : > { %348 = vmatpush.msra.mxu1 %v299_v12  ;;  %391 = vmatpush.msra.mxu2 %v382_v13  ;;  %v1115_v27 = vld [vmem:[%s1104_s28] sm:$0xff]  ;;  %v294_v28 = vld [vmem:[#allocation6 + $0x38] sm:$0xff]  ;;  %v376_v35 = vld [vmem:[#allocation6 + $0x128] sm:$0xff] }
  0x39   : > { %326 = vmatpush.msra.mxu0 %v317_v14  ;;  %v1118_v29 = vld [vmem:[%s1104_s28 + $0x8] sm:$0xff]  ;;  %282 = vst [vmem:[#allocation2 + $0x1] sm:$0xff] %v1115_v27  ;;  %v377_v30 = vld [vmem:[#allocation6 + $0x130] sm:$0xff]  ;;  %v375_v39 = vld [vmem:[#allocation6 + $0x120] sm:$0xff]  ;;  %p903_p8 = pneg %p902_p4 }
  0x3a   : > { %349 = vmatpush.msra.mxu1 %v298_v15  ;;  %392 = vmatpush.msra.mxu2 %v381_v16  ;;  %v312_v31 = vld [vmem:[#allocation6 + $0xb0] sm:$0xff]  ;;  %283 = vst [vmem:[#allocation2 + $0x9] sm:$0xff] %v1118_v29  ;;  %v458_v32 = vld [vmem:[#allocation8 + $0xf8] sm:$0xff]  ;;  %v311_v36 = vld [vmem:[#allocation6 + $0xa8] sm:$0xff] }
  0x3b   : > { %327 = vmatpush.msra.mxu0 %v316_v17  ;;  %v293_v33 = vld [vmem:[#allocation6 + $0x30] sm:$0xff]  ;;  %459 = vmatpush.msra.mxu3 %v458_v32  ;;  %v292_v37 = vld [vmem:[#allocation6 + $0x28] sm:$0xff]  ;;  %v310_v40 = vld [vmem:[#allocation6 + $0xa0] sm:$0xff]  ;;  %p908_p10 = pnand %p907_p9, %p903_p8 }
  0x3c   : > { %350 = vmatpush.msra.mxu1 %v297_v18  ;;  %393 = vmatpush.msra.mxu2 %v380_v19  ;;  %v457_v34 = vld [vmem:[#allocation8 + $0xf0] sm:$0xff]  ;;  %v456_v38 = vld [vmem:[#allocation8 + $0xe8] sm:$0xff]  ;;  %v291_v41 = vld [vmem:[#allocation6 + $0x20] sm:$0xff] }
  0x3d   : > { %328 = vmatpush.msra.mxu0 %v315_v20  ;;  %460 = vmatpush.msra.mxu3 %v457_v34  ;;  %v455_v42 = vld [vmem:[#allocation8 + $0xe0] sm:$0xff]  ;;  %v374_v43 = vld [vmem:[#allocation6 + $0x118] sm:$0xff]  ;;  %v373_v47 = vld [vmem:[#allocation6 + $0x110] sm:$0xff] }
  0x3e   : > { %351 = vmatpush.msra.mxu1 %v296_v21  ;;  %394 = vmatpush.msra.mxu2 %v379_v22  ;;  %v309_v44 = vld [vmem:[#allocation6 + $0x98] sm:$0xff]  ;;  %v308_v48 = vld [vmem:[#allocation6 + $0x90] sm:$0xff]  ;;  %v372_v49 = vld [vmem:[#allocation6 + $0x108] sm:$0xff] }
  0x3f   : > { %329 = vmatpush.msra.mxu0 %v314_v23  ;;  %461 = vmatpush.msra.mxu3 %v456_v38  ;;  %v290_v45 = vld [vmem:[#allocation6 + $0x18] sm:$0xff]  ;;  %v289_v50 = vld [vmem:[#allocation6 + $0x10] sm:$0xff]  ;;  %v307_v52 = vld [vmem:[#allocation6 + $0x88] sm:$0xff] }
  0x40   : > { %352 = vmatpush.msra.mxu1 %v295_v24  ;;  %395 = vmatpush.msra.mxu2 %v378_v25  ;;  %v454_v46 = vld [vmem:[#allocation8 + $0xd8] sm:$0xff]  ;;  %v453_v51 = vld [vmem:[#allocation8 + $0xd0] sm:$0xff]  ;;  %v288_v53 = vld [vmem:[#allocation6 + $0x8] sm:$0xff] }
  0x41   : > { %330 = vmatpush.msra.mxu0 %v313_v26  ;;  %462 = vmatpush.msra.mxu3 %v455_v42  ;;  %v452_v54 = vld [vmem:[#allocation8 + $0xc8] sm:$0xff]  ;;  %v371_v55 = vld [vmem:[#allocation6 + $0x100] sm:$0xff]  ;;  %v439_v61 = vld [vmem:[#allocation8 + $0x78] sm:$0xff] }
  0x42   : > { %353 = vmatpush.msra.mxu1 %v294_v28  ;;  %396 = vmatpush.msra.mxu2 %v377_v30  ;;  %v306_v56 = vld [vmem:[#allocation6 + $0x80] sm:$0xff]  ;;  %v368_v57 = vld [vmem:[#allocation2 + $0x2] sm:$0xff]  ;;  %v523_v62 = vld [vmem:[#allocation8 + $0x178] sm:$0xff] }
  0x43   : > { %331 = vmatpush.msra.mxu0 %v312_v31  ;;  %463 = vmatpush.msra.mxu3 %v454_v46  ;;  %v287_v58 = vld [vmem:[#allocation6] sm:$0xff]  ;;  %v285_v59 = vld [vmem:[#allocation2] sm:$0xff]  ;;  %v450_v63 = vld [vmem:[#allocation8 + $0xb8] sm:$0xff] }
  0x44   : > { %354 = vmatpush.msra.mxu1 %v293_v33  ;;  %397 = vmatpush.msra.mxu2 %v376_v35  ;;  %v451_v60 = vld [vmem:[#allocation8 + $0xc0] sm:$0xff]  ;;  %v438_v0 = vld [vmem:[#allocation8 + $0x70] sm:$0xff]  ;;  %v437_v3 = vld [vmem:[#allocation8 + $0x68] sm:$0xff] }
  0x45   : > { %332 = vmatpush.msra.mxu0 %v311_v36  ;;  %464 = vmatpush.msra.mxu3 %v453_v51  ;;  %v522_v1 = vld [vmem:[#allocation8 + $0x170] sm:$0xff]  ;;  %v521_v4 = vld [vmem:[#allocation8 + $0x168] sm:$0xff]  ;;  %v436_v8 = vld [vmem:[#allocation8 + $0x60] sm:$0xff] }
  0x46   : > { %355 = vmatpush.msra.mxu1 %v292_v37  ;;  %398 = vmatpush.msra.mxu2 %v375_v39  ;;  %v449_v2 = vld [vmem:[#allocation8 + $0xb0] sm:$0xff]  ;;  %v448_v6 = vld [vmem:[#allocation8 + $0xa8] sm:$0xff]  ;;  %v447_v9 = vld [vmem:[#allocation8 + $0xa0] sm:$0xff] }
  0x47   : > { %333 = vmatpush.msra.mxu0 %v310_v40  ;;  %465 = vmatpush.msra.mxu3 %v452_v54  ;;  %v369_v5 = vld [vmem:[#allocation2 + $0xa] sm:$0xff]  ;;  %v433_v14 = vld [vmem:[#allocation8 + $0x48] sm:$0xff]  ;;  %v443_v16 = vld [vmem:[#allocation8 + $0x80] sm:$0xff] }
  0x48   : > { %356 = vmatpush.msra.mxu1 %v291_v41  ;;  %399 = vmatpush.msra.mxu2 %v374_v43  ;;  %v286_v7 = vld [vmem:[#allocation2 + $0x8] sm:$0xff]  ;;  %v435_v10 = vld [vmem:[#allocation8 + $0x58] sm:$0xff]  ;;  %v444_v15 = vld [vmem:[#allocation8 + $0x88] sm:$0xff] }
  0x49   : > { %334 = vmatpush.msra.mxu0 %v309_v44  ;;  %466 = vmatpush.msra.mxu3 %v451_v60  ;;  %v446_v11 = vld [vmem:[#allocation8 + $0x98] sm:$0xff]  ;;  %v434_v12 = vld [vmem:[#allocation8 + $0x50] sm:$0xff]  ;;  %v432_v17 = vld [vmem:[#allocation8 + $0x40] sm:$0xff] }
  0x4a   : > { %357 = vmatpush.msra.mxu1 %v290_v45  ;;  %400 = vmatpush.msra.mxu2 %v373_v47  ;;  %v445_v13 = vld [vmem:[#allocation8 + $0x90] sm:$0xff]  ;;  %v520_v18 = vld [vmem:[#allocation8 + $0x160] sm:$0xff]  ;;  %v431_v19 = vld [vmem:[#allocation8 + $0x38] sm:$0xff] }
  0x4b   : > { %335 = vmatpush.msra.mxu0 %v308_v48  ;;  %467 = vmatpush.msra.mxu3 %v450_v63  ;;  %v519_v20 = vld [vmem:[#allocation8 + $0x158] sm:$0xff]  ;;  %v430_v21 = vld [vmem:[#allocation8 + $0x30] sm:$0xff]  ;;  %v429_v23 = vld [vmem:[#allocation8 + $0x28] sm:$0xff] }
  0x4c   : > { %358 = vmatpush.msra.mxu1 %v289_v50  ;;  %401 = vmatpush.msra.mxu2 %v372_v49  ;;  %v518_v22 = vld [vmem:[#allocation8 + $0x150] sm:$0xff]  ;;  %v517_v24 = vld [vmem:[#allocation8 + $0x148] sm:$0xff]  ;;  %v428_v25 = vld [vmem:[#allocation8 + $0x20] sm:$0xff] }
  0x4d   : > { %336 = vmatpush.msra.mxu0 %v307_v52  ;;  %468 = vmatpush.msra.mxu3 %v449_v2  ;;  %v516_v26 = vld [vmem:[#allocation8 + $0x140] sm:$0xff]  ;;  %v427_v28 = vld [vmem:[#allocation8 + $0x18] sm:$0xff]  ;;  %v426_v31 = vld [vmem:[#allocation8 + $0x10] sm:$0xff] }
  0x4e   : > { %359 = vmatpush.msra.mxu1 %v288_v53  ;;  %402 = vmatpush.msra.mxu2 %v371_v55  ;;  %v515_v30 = vld [vmem:[#allocation8 + $0x138] sm:$0xff]  ;;  %v514_v32 = vld [vmem:[#allocation8 + $0x130] sm:$0xff]  ;;  %v425_v33 = vld [vmem:[#allocation8 + $0x8] sm:$0xff] }
  0x4f   : > { %337 = vmatpush.msra.mxu0 %v306_v56  ;;  %403 = vmatmul.f32.vlgmr.msra.gmra.mxu2 %v368_v57  ;;  %v513_v34 = vld [vmem:[#allocation8 + $0x128] sm:$0xff]  ;;  %v424_v35 = vld [vmem:[#allocation8] sm:$0xff]  ;;  %v511_v37 = vld [vmem:[#allocation8 + $0x118] sm:$0xff] }
  0x50   : > { %360 = vmatpush.msra.mxu1 %v287_v58  ;;  %338 = vmatmul.f32.vlgmr.msra.gmra.mxu0 %v1115_v27  ;;  %v512_v36 = vld [vmem:[#allocation8 + $0x120] sm:$0xff]  ;;  %v510_v38 = vld [vmem:[#allocation8 + $0x110] sm:$0xff]  ;;  %v509_v39 = vld [vmem:[#allocation8 + $0x108] sm:$0xff] }
  0x51   : > { %361 = vmatmul.f32.vlgmr.msra.gmra.mxu1 %v285_v59  ;;  %482 = vmatpush.msrb.mxu0 %v439_v61  ;;  %v508_v40 = vld [vmem:[#allocation8 + $0x100] sm:$0xff]  ;;  %v792_v44 = vld [vmem:[%s1169_s2] ss:$0 sm:$0xff] }
  0x52   : > { %688 = vmatpush.msrb.mxu2 %v439_v61  ;;  %524 = vmatpush.msrb.mxu1 %v523_v62 }
  0x53   : > { %483 = vmatpush.msrb.mxu0 %v438_v0  ;;  %469 = vmatpush.msra.mxu3 %v448_v6 }
  0x54   : > { %689 = vmatpush.msrb.mxu2 %v438_v0  ;;  %525 = vmatpush.msrb.mxu1 %v522_v1  ;;  %v793_v0 = vld [vmem:[%s1171_s4] ss:$0 sm:$0xff] }
  0x55   : > { %484 = vmatpush.msrb.mxu0 %v437_v3  ;;  %470 = vmatpush.msra.mxu3 %v447_v9 }
  0x56   : > { %690 = vmatpush.msrb.mxu2 %v437_v3  ;;  %526 = vmatpush.msrb.mxu1 %v521_v4 }
  0x57   : > { %406 = vmatmul.f32.gmra.mxu2 %v369_v5  ;;  %485 = vmatpush.msrb.mxu0 %v436_v8 }
  0x58   : > { %341 = vmatmul.f32.gmra.mxu0 %v1118_v29  ;;  %691 = vmatpush.msrb.mxu2 %v436_v8 }
  0x59   : > { %364 = vmatmul.f32.gmra.mxu1 %v286_v7  ;;  %486 = vmatpush.msrb.mxu0 %v435_v10 }
  0x5a   : > { %471 = vmatpush.msra.mxu3 %v446_v11  ;;  %692 = vmatpush.msrb.mxu2 %v435_v10 }
  0x5b   : > { %487 = vmatpush.msrb.mxu0 %v434_v12  ;;  %527 = vmatpush.msrb.mxu1 %v520_v18 }
  0x5c   : > { %472 = vmatpush.msra.mxu3 %v445_v13  ;;  %693 = vmatpush.msrb.mxu2 %v434_v12 }
  0x5d   : > { %488 = vmatpush.msrb.mxu0 %v433_v14  ;;  %528 = vmatpush.msrb.mxu1 %v519_v20 }
  0x5e   : > { %473 = vmatpush.msra.mxu3 %v444_v15  ;;  %694 = vmatpush.msrb.mxu2 %v433_v14 }
  0x5f   : > { %489 = vmatpush.msrb.mxu0 %v432_v17  ;;  %529 = vmatpush.msrb.mxu1 %v518_v22 }
  0x60   : > { %474 = vmatpush.msra.mxu3 %v443_v16  ;;  %695 = vmatpush.msrb.mxu2 %v432_v17 }
  0x61   : > { %490 = vmatpush.msrb.mxu0 %v431_v19  ;;  %530 = vmatpush.msrb.mxu1 %v517_v24 }
  0x62   : > { %704 = vmatpush.msrb.mxu3 %v523_v62  ;;  %696 = vmatpush.msrb.mxu2 %v431_v19 }
  0x63   : > { %491 = vmatpush.msrb.mxu0 %v430_v21  ;;  %531 = vmatpush.msrb.mxu1 %v516_v26 }
  0x64   : > { %705 = vmatpush.msrb.mxu3 %v522_v1  ;;  %697 = vmatpush.msrb.mxu2 %v430_v21 }
  0x65   : > { %492 = vmatpush.msrb.mxu0 %v429_v23  ;;  %532 = vmatpush.msrb.mxu1 %v515_v30 }
  0x66   : > { %706 = vmatpush.msrb.mxu3 %v521_v4  ;;  %698 = vmatpush.msrb.mxu2 %v429_v23 }
  0x67   : > { %493 = vmatpush.msrb.mxu0 %v428_v25  ;;  %533 = vmatpush.msrb.mxu1 %v514_v32 }
  0x68   : > { %707 = vmatpush.msrb.mxu3 %v520_v18  ;;  %699 = vmatpush.msrb.mxu2 %v428_v25 }
  0x69   : > { %494 = vmatpush.msrb.mxu0 %v427_v28  ;;  %534 = vmatpush.msrb.mxu1 %v513_v34 }
  0x6a   : > { %708 = vmatpush.msrb.mxu3 %v519_v20  ;;  %700 = vmatpush.msrb.mxu2 %v427_v28 }
  0x6b   : > { %495 = vmatpush.msrb.mxu0 %v426_v31  ;;  %535 = vmatpush.msrb.mxu1 %v512_v36 }
  0x6c   : > { %709 = vmatpush.msrb.mxu3 %v518_v22  ;;  %701 = vmatpush.msrb.mxu2 %v426_v31 }
  0x6d   : > { %496 = vmatpush.msrb.mxu0 %v425_v33  ;;  %536 = vmatpush.msrb.mxu1 %v511_v37 }
  0x6e   : > { %710 = vmatpush.msrb.mxu3 %v517_v24  ;;  %702 = vmatpush.msrb.mxu2 %v425_v33 }
  0x6f   : > { %497 = vmatpush.msrb.mxu0 %v424_v35  ;;  %537 = vmatpush.msrb.mxu1 %v510_v38 }
  0x70   : > { %711 = vmatpush.msrb.mxu3 %v516_v26  ;;  %703 = vmatpush.msrb.mxu2 %v424_v35 }
  0x71   : > { %538 = vmatpush.msrb.mxu1 %v509_v39 }
  0x72   : > { %712 = vmatpush.msrb.mxu3 %v515_v30 }
  0x73   : > { %539 = vmatpush.msrb.mxu1 %v508_v40 }
  0x74   : > { %713 = vmatpush.msrb.mxu3 %v514_v32 }
  0x76   : > { %714 = vmatpush.msrb.mxu3 %v513_v34 }
  0x78   : > { %715 = vmatpush.msrb.mxu3 %v512_v36 }
  0x7a   : > { %716 = vmatpush.msrb.mxu3 %v511_v37 }
  0x7c   : > { %717 = vmatpush.msrb.mxu3 %v510_v38 }
  0x7e   : > { %718 = vmatpush.msrb.mxu3 %v509_v39 }
  0x80   : > { %719 = vmatpush.msrb.mxu3 %v508_v40 }
  0xcd   : > { %v339_v41 = vpop.f32.mrf.mxu0 }
  0xce   : > { %v362_v42 = vpop.f32.mrf.mxu1 }
  0xcf   : > { %v363_v43 = vadd.f32 %v362_v42, %v339_v41 }
  0xd2   : > { %v404_v45 = vpop.f32.mrf.mxu2 }
  0xd3   : > { %v410_v46 = vadd.f32 %v404_v45, %v363_v43 }
  0xd5   : > { %v415_v47 = vadd.f32 %v792_v44, %v410_v46  ;;  %v342_v48 = vpop.f32.mrf.mxu0 }
  0xd6   : > { %v365_v49 = vpop.f32.mrf.mxu1 }
  0xd7   : > { %v417_v50 = vmax.f32 %v415_v47, 0.0  ;;  %v366_v51 = vadd.f32 %v365_v49, %v342_v48 }
  0xd9   : > { %419 = vst [vmem:[#allocation2 + $0x1] sm:$0xff] %v417_v50  ;;  %475 = vmatmul.f32.vlgmr.msra.gmra.mxu3 %v417_v50 }
  0xda   : > { %v407_v52 = vpop.f32.mrf.mxu2 }
  0xdb   : > { %v411_v53 = vadd.f32 %v407_v52, %v366_v51 }
  0xdd   : > { %v416_v54 = vadd.f32 %v792_v44, %v411_v53 }
  0xdf   : > { %v418_v55 = vmax.f32 %v416_v54, 0.0 }
  0xe0   : > { %v422_v56 = vld [vmem:[#allocation2] sm:$0xff] }
  0xe1   : > { %420 = vst [vmem:[#allocation2 + $0x9] sm:$0xff] %v418_v55  ;;  %498 = vmatmul.f32.vlgmr.msrb.gmra.mxu0 %v422_v56  ;;  %478 = vmatmul.f32.gmra.mxu3 %v418_v55 }
  0xe8   : > { %v423_v57 = vld [vmem:[#allocation2 + $0x8] sm:$0xff] }
  0xe9   : > { %v505_v58 = vld [vmem:[#allocation2 + $0x2] sm:$0xff]  ;;  %v506_v59 = vld [vmem:[#allocation2 + $0xa] sm:$0xff]  ;;  %501 = vmatmul.f32.vlgmr.msrb.gmra.mxu2 %v423_v57 }
  0xea   : > { %540 = vmatmul.f32.vlgmr.msrb.gmra.mxu1 %v505_v58  ;;  %543 = vmatmul.f32.vlgmr.msrb.gmra.mxu3 %v506_v59 }
 0x15c   : > { %v476_v60 = vpop.f32.mrf.mxu3 }
 0x15e   : > { %v499_v61 = vpop.f32.mrf.mxu0 }
 0x15f   : > { %v500_v63 = vadd.f32 %v499_v61, %v476_v60 }
 0x164   : > { %v479_v62 = vpop.f32.mrf.mxu3 }
 0x167   : > { %v541_v1 = vpop.f32.mrf.mxu1 }
 0x168   : > { %v547_v2 = vadd.f32 %v541_v1, %v500_v63 }
 0x16a   : > { %v552_v3 = vadd.f32 %v793_v0, %v547_v2 }
 0x16c   : > { %v554_v4 = vadd.f32 %v552_v3, %v1115_v27  ;;  %v502_v5 = vpop.f32.mrf.mxu2 }
 0x16d   : > { %v503_v7 = vadd.f32 %v502_v5, %v479_v62  ;;  %v544_v8 = vpop.f32.mrf.mxu3 }
 0x16e   : > { %v556_v6 = vmax.f32 %v554_v4, 0.0 }
 0x16f   : > { %v548_v9 = vadd.f32 %v544_v8, %v503_v7 }
 0x170   : > { %558 = vst [vmem:[%s277_s30] sm:$0xff] %v556_v6 }
 0x171   : > { %v553_v10 = vadd.f32 %v793_v0, %v548_v9 }
 0x173   : > { %v555_v27 = vadd.f32 %v553_v10, %v1118_v29 }
 0x175   : > { %v557_v11 = vmax.f32 %v555_v27, 0.0 }
 0x177   : > { %559 = vst [vmem:[%s277_s30 + $0x8] sm:$0xff] %v557_v11 }
 0x178   : > { %911 = shalt.err (!%p908_p10)
}
 0x179   : > { %s961_s8 = smov 128   ;;  %s962_s9 = smov 8  }
 0x17a   : > { %730 = dma.vmem_to_hbm [thread:$0]  (%p1065_p3), %s574_s6, 256, %s576_s7, %s561_s22, %s961_s8, %s961_s8, %s962_s9  }
 0x17b PF: > { %s590_s12 = sand.u32 1, %s942_s18   ;;  %p1180_p12 = scmp.ge.s32.totalorder %s954_s21, 2 }
 0x17c   : > { %s591_s13 = scalar_lea.sflag [#allocation5], %s590_s12 }
 0x17d   : > { %p744_p13 = pnand %p1180_p12, %p1028_p6 }
 0x17f   : > { %p745_p0 = pneg %p744_p13 }
 0x181   : > { %937 = dma.done.wait (%p745_p0), %s591_s13, 256  }
 0x182   : > { %939 = vsyncadd (%p745_p0), %s591_s13, 4294967040  ;;  %p19_p5 = scmp.ge.s32.totalorder %s1055_s14, 4   ;;  %s1181_s18 = smov %s946_s19 }
 0x183   : > { %s1182_s19 = smov %s950_s20  ;;  %s1183_s20 = smov %s1071_s23 }
 0x184   : > { %s1184_s21 = smov %s1055_s14  ;;  %21 = sbr.rel (!%p19_p5) target bundleno = 6 (0x6), region = 97 }
 0x189   :  { %597 = vsyncpa [#allocation4], 1 }
 0x18a   :  { %599 = vsyncpa [#allocation4 + $0x1], 1 }
 0x18b   :  { %600 = vsyncpa [#allocation7], 1 }
 0x18c   :  { %601 = vsyncpa [#allocation5], 1 }
 0x18d   :  { %603 = vsyncpa [#allocation5 + $0x1], 1 }

</bundles_post_ra>
